<compile_context>
chip_gen: v7x
topology: tpu7x:2x2x1
jax: 0.10.0
libtpu: 0.0.40
codegen_flags: <defaults>
</compile_context>

<pallas_src>
import functools

import jax
import jax.numpy as jnp
from jax.experimental import pallas as pl
from jax.experimental.pallas import tpu as pltpu


def policy_kernel(x_ref, w1_ref, b1_ref, wh_ref, bh_ref, out_ref):
    # Hidden layer: relu(W1 (128,6) @ xT (6,TB) + b1 (128,1)) -> (128, TB)
    h = jnp.maximum(
        jnp.dot(w1_ref[...], x_ref[...], preferred_element_type=jnp.float32)
        + b1_ref[...],
        0.0,
    )

    # Fused action+value heads: (8,128) @ (128,TB) + (8,1) -> (8, TB)
    head = (
        jnp.dot(wh_ref[...], h, preferred_element_type=jnp.float32) + bh_ref[...]
    )

    # Softmax over sublanes 0-3 (action logits); sublane 4 is the state value,
    # sublanes 5-7 are zero padding (zero weights + zero bias).
    row = jax.lax.broadcasted_iota(jnp.int32, head.shape, 0)
    is_logit = row < 4
    masked = jnp.where(is_logit, head, -jnp.inf)
    m = jnp.max(masked, axis=0, keepdims=True)          # (1, TB)
    e = jnp.exp(masked - m)                              # exp(-inf) = 0 on pad rows
    s = jnp.sum(e, axis=0, keepdims=True)                # (1, TB)
    inv = pl.reciprocal(s, approx=True)                  # EUP fast path
    inv = inv * (2.0 - s * inv)                          # one Newton step -> ~f32 exact
    probs = e * inv

    # Single merged store: sublanes 0-3 = probs, 4 = value, 5-7 = 0.
    out_ref[...] = jnp.where(is_logit, probs, head)


def pack_params(params):
    """Fuse the two heads once, ahead of time (native PyTorch layouts kept)."""
    w1, b1, wa, ba, wv, bv = params
    b1c = b1.reshape(128, 1)
    w_heads = jnp.concatenate(
        [wa, wv, jnp.zeros((3, 128), jnp.float32)], axis=0)              # (8, 128)
    b_heads = jnp.concatenate(
        [ba, bv, jnp.zeros((3,), jnp.float32)], axis=0).reshape(8, 1)    # (8, 1)
    return (w1, b1c, w_heads, b_heads)


def _round_up(n, m):
    return ((n + m - 1) // m) * m


@functools.partial(jax.jit, static_argnames=())
def policy_forward(x, packed_params):
    w1, b1, w_heads, b_heads = packed_params
    B = x.shape[0]

    # Batch tile: multiple of 128 (lane-dense), capped so double-buffered tiles
    # stay far inside scoped VMEM even on v7x (64 MiB physical).
    TB = min(2048, _round_up(B, 128))
    B_pad = _round_up(B, TB)

    if B_pad != B:
        x = jnp.pad(x, ((0, B_pad - B), (0, 0)))
    xT = x.T  # (6, B_pad) -- batch on the lane axis

    out = pl.pallas_call(
        policy_kernel,
        out_shape=jax.ShapeDtypeStruct((8, B_pad), jnp.float32),
        grid=(B_pad // TB,),
        in_specs=[
            pl.BlockSpec((6, TB), lambda i: (0, i)),     # x^T batch tile
            pl.BlockSpec((128, 6), lambda i: (0, 0)),    # W1 (PyTorch layout)
            pl.BlockSpec((128, 1), lambda i: (0, 0)),    # b1
            pl.BlockSpec((8, 128), lambda i: (0, 0)),    # fused heads weight
            pl.BlockSpec((8, 1), lambda i: (0, 0)),      # fused heads bias
        ],
        out_specs=pl.BlockSpec((8, TB), lambda i: (0, i)),
        compiler_params=pltpu.CompilerParams(
            dimension_semantics=("parallel",)),
    )(xT, w1, b1, w_heads, b_heads)

    out = out[:, :B].T            # (B, 8) -- wrapper-side layout plumbing
    action_prob = out[:, 0:4]
    state_values = out[:, 4:5]
    return action_prob, state_values


def init_params(key):
    """Parameters in native PyTorch nn.Linear layouts."""
    k1, k2, k3, k4, k5, k6 = jax.random.split(key, 6)
    w1 = jax.random.uniform(k1, (128, 6), jnp.float32, -0.1, 0.1)   # Linear(6,128).weight
    b1 = jax.random.uniform(k2, (128,), jnp.float32, -0.1, 0.1)     # Linear(6,128).bias
    wa = jax.random.uniform(k3, (4, 128), jnp.float32, -0.1, 0.1)   # Linear(128,4).weight
    ba = jax.random.uniform(k4, (4,), jnp.float32, -0.1, 0.1)       # Linear(128,4).bias
    wv = jax.random.uniform(k5, (1, 128), jnp.float32, -0.1, 0.1)   # Linear(128,1).weight
    bv = jax.random.uniform(k6, (1,), jnp.float32, -0.1, 0.1)       # Linear(128,1).bias
    return (w1, b1, wa, ba, wv, bv)


def reference_forward(x, params):
    w1, b1, wa, ba, wv, bv = params
    h = jnp.maximum(x @ w1.T + b1, 0.0)
    logits = h @ wa.T + ba
    probs = jax.nn.softmax(logits, axis=-1)
    vals = h @ wv.T + bv
    return probs, vals


if __name__ == "__main__":
    key = jax.random.PRNGKey(0)
    kx, kp = jax.random.split(key)
    B = 8
    x = jax.random.normal(kx, (B, 6), jnp.float32)
    params = init_params(kp)
    packed = pack_params(params)

    probs, vals = policy_forward(x, packed)
    probs = jax.block_until_ready(probs)
    vals = jax.block_until_ready(vals)

    ref_probs, ref_vals = reference_forward(x, params)
    assert probs.shape == (B, 4) and vals.shape == (B, 1)
    assert jnp.allclose(probs, ref_probs, atol=1e-5, rtol=1e-5)
    assert jnp.allclose(vals, ref_vals, atol=1e-5, rtol=1e-5)
    assert jnp.allclose(jnp.sum(probs, axis=-1), 1.0, atol=1e-5)

    print("KERNEL_OK")
</pallas_src>

<mosaic_0001>
module attributes {stable_mosaic.version = 11 : i64} {
  func.func @policy_kernel(%arg0: i32, %arg1: memref<6x128xf32, #tpu.memory_space<vmem>>, %arg2: memref<128x6xf32, #tpu.memory_space<vmem>>, %arg3: memref<128x1xf32, #tpu.memory_space<vmem>>, %arg4: memref<8x128xf32, #tpu.memory_space<vmem>>, %arg5: memref<8x1xf32, #tpu.memory_space<vmem>>, %arg6: memref<8x128xf32, #tpu.memory_space<vmem>>) attributes {dimension_semantics = [#tpu.dimension_semantics<parallel>], iteration_bounds = array<i64: 1>, scalar_prefetch = 0 : i64, scratch_operands = 0 : i64, tpu.core_type = #tpu.core_type<tc>, window_params = [{transform_indices = @transform_0, window_bounds = array<i64: 6, 128>}, {pipeline_mode = #tpu.pipeline_mode<synchronous>, transform_indices = @transform_1, window_bounds = array<i64: 128, 6>}, {pipeline_mode = #tpu.pipeline_mode<synchronous>, transform_indices = @transform_2, window_bounds = array<i64: 128, 1>}, {pipeline_mode = #tpu.pipeline_mode<synchronous>, transform_indices = @transform_3, window_bounds = array<i64: 8, 128>}, {pipeline_mode = #tpu.pipeline_mode<synchronous>, transform_indices = @transform_4, window_bounds = array<i64: 8, 1>}, {transform_indices = @transform_5, window_bounds = array<i64: 8, 128>}]} {
    %c0 = arith.constant 0 : index
    %c0_0 = arith.constant 0 : index
    %0 = vector.load %arg2[%c0, %c0_0] : memref<128x6xf32, #tpu.memory_space<vmem>>, vector<128x6xf32>
    %c0_1 = arith.constant 0 : index
    %c0_2 = arith.constant 0 : index
    %1 = vector.load %arg1[%c0_1, %c0_2] : memref<6x128xf32, #tpu.memory_space<vmem>>, vector<6x128xf32>
    %cst = arith.constant dense<0.000000e+00> : vector<128x128xf32>
    %2 = tpu.matmul %0, %1, %cst {dimension_numbers = #tpu.dot_dimension_numbers<[1], [0], [0], [1], [0, 0, 1, 1], [], []>} : vector<128x6xf32>, vector<6x128xf32>, vector<128x128xf32> -> vector<128x128xf32>
    %c0_3 = arith.constant 0 : index
    %c0_4 = arith.constant 0 : index
    %3 = vector.load %arg3[%c0_3, %c0_4] : memref<128x1xf32, #tpu.memory_space<vmem>>, vector<128x1xf32>
    %4 = vector.broadcast %3 : vector<128x1xf32> to vector<128x128xf32>
    %5 = arith.addf %2, %4 : vector<128x128xf32>
    %cst_5 = arith.constant 0.000000e+00 : f32
    %6 = vector.broadcast %cst_5 : f32 to vector<128x128xf32>
    %7 = arith.maximumf %5, %6 : vector<128x128xf32>
    %c0_6 = arith.constant 0 : index
    %c0_7 = arith.constant 0 : index
    %8 = vector.load %arg4[%c0_6, %c0_7] : memref<8x128xf32, #tpu.memory_space<vmem>>, vector<8x128xf32>
    %cst_8 = arith.constant dense<0.000000e+00> : vector<8x128xf32>
    %9 = tpu.matmul %8, %7, %cst_8 {dimension_numbers = #tpu.dot_dimension_numbers<[1], [0], [0], [1], [0, 0, 1, 1], [], []>} : vector<8x128xf32>, vector<128x128xf32>, vector<8x128xf32> -> vector<8x128xf32>
    %c0_9 = arith.constant 0 : index
    %c0_10 = arith.constant 0 : index
    %10 = vector.load %arg5[%c0_9, %c0_10] : memref<8x1xf32, #tpu.memory_space<vmem>>, vector<8x1xf32>
    %11 = vector.broadcast %10 : vector<8x1xf32> to vector<8x128xf32>
    %12 = arith.addf %9, %11 : vector<8x128xf32>
    %13 = tpu.iota {dimensions = array<i32: 0>} : vector<8x128xi32>
    %c4_i32 = arith.constant 4 : i32
    %14 = vector.broadcast %c4_i32 : i32 to vector<8x128xi32>
    %15 = arith.cmpi slt, %13, %14 : vector<8x128xi32>
    %cst_11 = arith.constant 0xFF800000 : f32
    %16 = vector.broadcast %cst_11 : f32 to vector<8x128xf32>
    %17 = arith.select %15, %12, %16 : vector<8x128xi1>, vector<8x128xf32>
    %cst_12 = arith.constant dense<0xFF800000> : vector<128xf32>
    %18 = vector.multi_reduction <maximumf>, %17, %cst_12 [0] : vector<8x128xf32> to vector<128xf32>
    %19 = vector.shape_cast %18 : vector<128xf32> to vector<1x128xf32>
    %20 = vector.broadcast %19 : vector<1x128xf32> to vector<8x128xf32>
    %21 = arith.subf %17, %20 : vector<8x128xf32>
    %22 = math.exp %21 : vector<8x128xf32>
    %cst_13 = arith.constant dense<0.000000e+00> : vector<128xf32>
    %23 = vector.multi_reduction <add>, %22, %cst_13 [0] : vector<8x128xf32> to vector<128xf32>
    %24 = vector.shape_cast %23 : vector<128xf32> to vector<1x128xf32>
    %25 = tpu.reciprocal %24 {approx = true} : vector<1x128xf32> -> vector<1x128xf32>
    %26 = arith.mulf %24, %25 : vector<1x128xf32>
    %cst_14 = arith.constant 2.000000e+00 : f32
    %27 = vector.broadcast %cst_14 : f32 to vector<1x128xf32>
    %28 = arith.subf %27, %26 : vector<1x128xf32>
    %29 = arith.mulf %25, %28 : vector<1x128xf32>
    %30 = vector.broadcast %29 : vector<1x128xf32> to vector<8x128xf32>
    %31 = arith.mulf %22, %30 : vector<8x128xf32>
    %32 = arith.select %15, %31, %12 : vector<8x128xi1>, vector<8x128xf32>
    %c0_15 = arith.constant 0 : index
    %c0_16 = arith.constant 0 : index
    %33 = vector.load %arg6[%c0_15, %c0_16] : memref<8x128xf32, #tpu.memory_space<vmem>>, vector<8x128xf32>
    tpu.vector_store %arg6[%c0_15, %c0_16], %32 {strides = array<i32>} : memref<8x128xf32, #tpu.memory_space<vmem>>, vector<8x128xf32>,
    return
  }
  func.func @transform_0(%arg0: i32) -> (i32, i32) {
    %c0_i32 = arith.constant 0 : i32
    %c0_i32_0 = arith.constant 0 : i32
    return %c0_i32, %arg0 : i32, i32
  }
  func.func @transform_1(%arg0: i32) -> (i32, i32) {
    %c0_i32 = arith.constant 0 : i32
    %c0_i32_0 = arith.constant 0 : i32
    %c0_i32_1 = arith.constant 0 : i32
    return %c0_i32, %c0_i32_0 : i32, i32
  }
  func.func @transform_2(%arg0: i32) -> (i32, i32) {
    %c0_i32 = arith.constant 0 : i32
    %c0_i32_0 = arith.constant 0 : i32
    %c0_i32_1 = arith.constant 0 : i32
    return %c0_i32, %c0_i32_0 : i32, i32
  }
  func.func @transform_3(%arg0: i32) -> (i32, i32) {
    %c0_i32 = arith.constant 0 : i32
    %c0_i32_0 = arith.constant 0 : i32
    %c0_i32_1 = arith.constant 0 : i32
    return %c0_i32, %c0_i32_0 : i32, i32
  }
  func.func @transform_4(%arg0: i32) -> (i32, i32) {
    %c0_i32 = arith.constant 0 : i32
    %c0_i32_0 = arith.constant 0 : i32
    %c0_i32_1 = arith.constant 0 : i32
    return %c0_i32, %c0_i32_0 : i32, i32
  }
  func.func @transform_5(%arg0: i32) -> (i32, i32) {
    %c0_i32 = arith.constant 0 : i32
    %c0_i32_0 = arith.constant 0 : i32
    return %c0_i32, %arg0 : i32, i32
  }
}

</mosaic_0001>

<bundles_post_ra>
// kernel: policy_forward.1
= control target key start
LH: loop header
LB: loop body
LE: loop exit
PB: predicated region body
PF: predicated region fallthrough
CT: control target
= control target key end

     0   :  { %vm182_vm0 = vcmask 1045504   ;;  %vm133_vm1 = vcmask 48128   ;;  %v600_v3 = vmov 0   ;;  %v601_v35 = vmov 0.0|0.0   ;;  %s768_s0 = inlined_call_operand.vmem [shape: f32[6,128], index: 0, kind: input, shape index: {}]   ;;  %s769_s1 = inlined_call_operand.vmem [shape: f32[128,6], index: 1, kind: input, shape index: {}]   ;;  %s770_s2 = inlined_call_operand.vmem [shape: f32[128,1], index: 2, kind: input, shape index: {}]   ;;  %s771_s4 = inlined_call_operand.vmem [shape: f32[8,1], index: 4, kind: input, shape index: {}]   ;;  %s772_s3 = inlined_call_operand.vmem [shape: f32[8,128], index: 3, kind: input, shape index: {}]   ;;  %s773_s5 = inlined_call_operand.vmem [shape: f32[8,128], index: 5, kind: output, shape index: {}]  }
   0x1   :  { %v36_v0 = vld [vmem:[%s768_s0] sm:$0x3f]  ;;  %v21_v2 = vld [vmem:[%s769_s1 + $0x8] sm:$0xff]  ;;  %594 = vset.pattern.permute.xlu0 %v600_v3  ;;  %595 = vset.pattern.permute.xlu1 %v600_v3  ;;  %v22_v4 = vld [vmem:[%s769_s1 + $0x10] sm:$0xff]  ;;  %vm602_vm2 = vmmov 0   ;;  %v603_v36 = vmov 0.0  }
   0x2   :  { %v20_v1 = vld [vmem:[%s769_s1] sm:$0xff]  ;;  %505 = vmatprep.subr.msk.mxu0 %vm182_vm0, %v36_v0  ;;  %v23_v5 = vld [vmem:[%s769_s1 + $0x18] sm:$0xff]  ;;  %v39_v8 = vld [vmem:[%s770_s2 + $0x10] sm:$0xff]  ;;  %566 = vmatprep.subr.bf16.mxu1 %v601_v35 }
   0x3   :  { %507 = vmatprep.mubr.msk.f32.mxu0 %vm133_vm1, %v20_v1  ;;  %506 = vmatpush3.msk.msra.mxu0 %vm182_vm0, %v36_v0  ;;  %v24_v6 = vld [vmem:[%s769_s1 + $0x20] sm:$0xff]  ;;  %v38_v9 = vld [vmem:[%s770_s2 + $0x8] sm:$0xff]  ;;  %v40_v11 = vld [vmem:[%s770_s2 + $0x18] sm:$0xff] }
   0x4   :  { %508 = vmatmul.mubr.msk.f32.vlgmr.msra.gmra.mrb[0].mxu0 %vm133_vm1, %v21_v2  ;;  %v37_v7 = vld [vmem:[%s770_s2] sm:$0xff]  ;;  %65 = vperm.xlu1 %595, %v39_v8   ;;  %v25_v10 = vld [vmem:[%s769_s1 + $0x28] sm:$0xff]  ;;  %v26_v12 = vld [vmem:[%s769_s1 + $0x30] sm:$0xff] }
   0x5   :  { %510 = vmatprep.mubr.msk.f32.mxu0 %vm133_vm1, %v22_v4  ;;  %55 = vperm.xlu0 %594, %v37_v7   ;;  %v41_v13 = vld [vmem:[%s770_s2 + $0x20] sm:$0xff]  ;;  %v27_v14 = vld [vmem:[%s769_s1 + $0x38] sm:$0xff]  ;;  %v42_v15 = vld [vmem:[%s770_s2 + $0x28] sm:$0xff] }
   0x6   :  { %v28_v16 = vld [vmem:[%s769_s1 + $0x40] sm:$0xff]  ;;  %v43_v17 = vld [vmem:[%s770_s2 + $0x30] sm:$0xff]  ;;  %v29_v18 = vld [vmem:[%s769_s1 + $0x48] sm:$0xff]  ;;  %563 = vmatprep.mubr.msk.f32.mxu1 %vm602_vm2, %v603_v36 }
   0x7   :  { %v44_v19 = vld [vmem:[%s770_s2 + $0x38] sm:$0xff]  ;;  %v30_v20 = vld [vmem:[%s769_s1 + $0x50] sm:$0xff]  ;;  %v45_v21 = vld [vmem:[%s770_s2 + $0x40] sm:$0xff] }
   0x8   :  { %511 = vmatmul.mubr.msk.f32.gmra.mrb[2].mxu0 %vm133_vm1, %v23_v5  ;;  %70 = vperm.xlu1 %595, %v40_v11   ;;  %v31_v22 = vld [vmem:[%s769_s1 + $0x58] sm:$0xff]  ;;  %v46_v23 = vld [vmem:[%s770_s2 + $0x48] sm:$0xff]  ;;  %v32_v24 = vld [vmem:[%s769_s1 + $0x60] sm:$0xff] }
   0x9   :  { %513 = vmatprep.mubr.msk.f32.mxu0 %vm133_vm1, %v24_v6  ;;  %60 = vperm.xlu0 %594, %v38_v9   ;;  %v47_v25 = vld [vmem:[%s770_s2 + $0x50] sm:$0xff]  ;;  %v33_v26 = vld [vmem:[%s769_s1 + $0x68] sm:$0xff]  ;;  %v48_v27 = vld [vmem:[%s770_s2 + $0x58] sm:$0xff] }
   0xa   :  { %v34_v28 = vld [vmem:[%s769_s1 + $0x70] sm:$0xff]  ;;  %v49_v29 = vld [vmem:[%s770_s2 + $0x60] sm:$0xff]  ;;  %v35_v30 = vld [vmem:[%s769_s1 + $0x78] sm:$0xff] }
   0xb   :  { %v50_v31 = vld [vmem:[%s770_s2 + $0x68] sm:$0xff]  ;;  %v51_v32 = vld [vmem:[%s770_s2 + $0x70] sm:$0xff]  ;;  %v52_v33 = vld [vmem:[%s770_s2 + $0x78] sm:$0xff] }
   0xc   :  { %514 = vmatmul.mubr.msk.f32.gmra.mrb[4].mxu0 %vm133_vm1, %v25_v10  ;;  %80 = vperm.xlu1 %595, %v42_v15   ;;  %v348_v34 = vld [vmem:[%s771_s4] sm:$0xff] }
   0xd   :  { %516 = vmatprep.mubr.msk.f32.mxu0 %vm133_vm1, %v26_v12  ;;  %75 = vperm.xlu0 %594, %v41_v13  }
  0x10   :  { %517 = vmatmul.mubr.msk.f32.gmra.mrb[6].mxu0 %vm133_vm1, %v27_v14  ;;  %90 = vperm.xlu1 %595, %v44_v19  }
  0x11   :  { %519 = vmatprep.mubr.msk.f32.mxu0 %vm133_vm1, %v28_v16  ;;  %85 = vperm.xlu0 %594, %v43_v17  }
  0x14   :  { %520 = vmatmul.mubr.msk.f32.gmra.mrb[8].mxu0 %vm133_vm1, %v29_v18  ;;  %100 = vperm.xlu1 %595, %v46_v23  }
  0x15   :  { %522 = vmatprep.mubr.msk.f32.mxu0 %vm133_vm1, %v30_v20  ;;  %95 = vperm.xlu0 %594, %v45_v21  }
  0x18   :  { %523 = vmatmul.mubr.msk.f32.gmra.mrb[10].mxu0 %vm133_vm1, %v31_v22  ;;  %110 = vperm.xlu1 %595, %v48_v27  }
  0x19   :  { %525 = vmatprep.mubr.msk.f32.mxu0 %vm133_vm1, %v32_v24  ;;  %105 = vperm.xlu0 %594, %v47_v25  }
  0x1c   :  { %526 = vmatmul.mubr.msk.f32.gmra.mrb[12].mxu0 %vm133_vm1, %v33_v26  ;;  %120 = vperm.xlu1 %595, %v50_v31  }
  0x1d   :  { %528 = vmatprep.mubr.msk.f32.mxu0 %vm133_vm1, %v34_v28  ;;  %115 = vperm.xlu0 %594, %v49_v29  }
  0x20   :  { %529 = vmatmul.mubr.msk.f32.gmra.mrb[14].mxu0 %vm133_vm1, %v35_v30  ;;  %130 = vperm.xlu1 %595, %v52_v33  }
  0x21   :  { %125 = vperm.xlu0 %594, %v51_v32  }
  0x25   :  { %351 = vperm.xlu0 %594, %v348_v34  }
  0x83   :  { %v66_v37 = vpop.permute.xlu1 %65 }
  0x84   :  { %v56_v38 = vpop.permute.xlu0 %55 }
  0x87   :  { %v71_v39 = vpop.permute.xlu1 %70 }
  0x88   :  { %v61_v40 = vpop.permute.xlu0 %60 }
  0x8b   :  { %v81_v41 = vpop.permute.xlu1 %80 }
  0x8c   :  { %v76_v42 = vpop.permute.xlu0 %75 }
  0x8f   :  { %v91_v48 = vpop.permute.xlu1 %90 }
  0x90   :  { %v86_v51 = vpop.permute.xlu0 %85 }
  0x93   :  { %v101_v61 = vpop.permute.xlu1 %100 }
  0x94   :  { %v96_v0 = vpop.permute.xlu0 %95 }
  0x97   :  { %v111_v9 = vpop.permute.xlu1 %110 }
  0x98   :  { %v106_v12 = vpop.permute.xlu0 %105 }
  0x9b   :  { %v121_v22 = vpop.permute.xlu1 %120 }
  0x9c   :  { %v116_v25 = vpop.permute.xlu0 %115 }
  0x9f   :  { %v131_v34 = vpop.permute.xlu1 %130 }
  0xd7   :  { %v509_v43 = vpop.f32.mrb[0].mxu0 }
  0xd8   :  { %v258_v44 = vadd.f32 %v509_v43, %v61_v40  ;;  %v252_v45 = vpop.f32.mrb[1].mxu0 }
  0xd9   :  { %v253_v46 = vadd.f32 %v252_v45, %v56_v38  ;;  %v126_v38 = vpop.permute.xlu0 %125 }
  0xda   :  { %v332_v47 = vmax.f32 %v258_v44, 0.0 }
  0xdb   :  { %v331_v49 = vmax.f32 %v253_v46, 0.0  ;;  %v512_v50 = vpop.f32.mrb[2].mxu0  ;;  %v347_v46 = vld [vmem:[%s772_s3] sm:$0xff] }
  0xdc   :  { %v268_v52 = vadd.f32 %v512_v50, %v71_v39  ;;  %v262_v53 = vpop.f32.mrb[3].mxu0 }
  0xdd   :  { %v263_v54 = vadd.f32 %v262_v53, %v66_v37  ;;  %v567_v55 = vpack.c.bf16 %v332_v47, %v331_v49  ;;  %v424_v47 = vlaneseq  ;;  %v352_v49 = vpop.permute.xlu0 %351 }
  0xde   :  { %v334_v56 = vmax.f32 %v268_v52, 0.0 }
  0xdf   :  { %v333_v57 = vmax.f32 %v263_v54, 0.0  ;;  %v515_v58 = vpop.f32.mrb[4].mxu0  ;;  %568 = vmatpush3.bf16.msra.mxu1 %v567_v55 }
  0xe0   :  { %v278_v59 = vadd.f32 %v515_v58, %v81_v41  ;;  %v272_v60 = vpop.f32.mrb[5].mxu0  ;;  %569 = vmatprep.subr.bf16.mxu1 %v601_v35 }
  0xe1   :  { %v570_v62 = vpack.c.bf16 %v334_v56, %v333_v57  ;;  %v273_v63 = vadd.f32 %v272_v60, %v76_v42 }
  0xe2   :  { %v336_v1 = vmax.f32 %v278_v59, 0.0 }
  0xe3   :  { %v335_v2 = vmax.f32 %v273_v63, 0.0  ;;  %v518_v3 = vpop.f32.mrb[6].mxu0  ;;  %571 = vmatpush3.bf16.msra.mxu1 %v570_v62 }
  0xe4   :  { %v288_v4 = vadd.f32 %v518_v3, %v91_v48  ;;  %v282_v5 = vpop.f32.mrb[7].mxu0  ;;  %572 = vmatprep.subr.bf16.mxu1 %v601_v35  ;;  %v425_v48 = vshrl.u32 %v424_v47, 7 }
  0xe5   :  { %v573_v6 = vpack.c.bf16 %v336_v1, %v335_v2  ;;  %v283_v7 = vadd.f32 %v282_v5, %v86_v51 }
  0xe6   :  { %v338_v8 = vmax.f32 %v288_v4, 0.0  ;;  %vm426_vm3 = vcmp.lt.s32.totalorder %v425_v48, 4 }
  0xe7   :  { %v337_v10 = vmax.f32 %v283_v7, 0.0  ;;  %v521_v11 = vpop.f32.mrb[8].mxu0  ;;  %574 = vmatpush3.bf16.msra.mxu1 %v573_v6 }
  0xe8   :  { %v298_v13 = vadd.f32 %v521_v11, %v101_v61  ;;  %v292_v14 = vpop.f32.mrb[9].mxu0  ;;  %575 = vmatprep.subr.bf16.mxu1 %v601_v35 }
  0xe9   :  { %v576_v15 = vpack.c.bf16 %v338_v8, %v337_v10  ;;  %v293_v16 = vadd.f32 %v292_v14, %v96_v0 }
  0xea   :  { %v340_v17 = vmax.f32 %v298_v13, 0.0 }
  0xeb   :  { %v339_v18 = vmax.f32 %v293_v16, 0.0  ;;  %v524_v19 = vpop.f32.mrb[10].mxu0  ;;  %577 = vmatpush3.bf16.msra.mxu1 %v576_v15 }
  0xec   :  { %v308_v20 = vadd.f32 %v524_v19, %v111_v9  ;;  %v302_v21 = vpop.f32.mrb[11].mxu0  ;;  %578 = vmatprep.subr.bf16.mxu1 %v601_v35 }
  0xed   :  { %v579_v23 = vpack.c.bf16 %v340_v17, %v339_v18  ;;  %v303_v24 = vadd.f32 %v302_v21, %v106_v12 }
  0xee   :  { %v342_v26 = vmax.f32 %v308_v20, 0.0 }
  0xef   :  { %v341_v27 = vmax.f32 %v303_v24, 0.0  ;;  %v527_v28 = vpop.f32.mrb[12].mxu0  ;;  %580 = vmatpush3.bf16.msra.mxu1 %v579_v23 }
  0xf0   :  { %v318_v29 = vadd.f32 %v527_v28, %v121_v22  ;;  %v312_v30 = vpop.f32.mrb[13].mxu0  ;;  %581 = vmatprep.subr.bf16.mxu1 %v601_v35 }
  0xf1   :  { %v582_v31 = vpack.c.bf16 %v342_v26, %v341_v27  ;;  %v313_v32 = vadd.f32 %v312_v30, %v116_v25 }
  0xf2   :  { %v344_v33 = vmax.f32 %v318_v29, 0.0 }
  0xf3   :  { %v343_v36 = vmax.f32 %v313_v32, 0.0  ;;  %v530_v37 = vpop.f32.mrb[14].mxu0  ;;  %583 = vmatpush3.bf16.msra.mxu1 %v582_v31 }
  0xf4   :  { %v328_v39 = vadd.f32 %v530_v37, %v131_v34  ;;  %v322_v40 = vpop.f32.mrb[15].mxu0  ;;  %584 = vmatprep.subr.bf16.mxu1 %v601_v35 }
  0xf5   :  { %v585_v41 = vpack.c.bf16 %v344_v33, %v343_v36  ;;  %v323_v42 = vadd.f32 %v322_v40, %v126_v38 }
  0xf6   :  { %v346_v43 = vmax.f32 %v328_v39, 0.0 }
  0xf7   :  { %v345_v44 = vmax.f32 %v323_v42, 0.0  ;;  %586 = vmatpush3.bf16.msra.mxu1 %v585_v41 }
  0xf8   :  { %587 = vmatprep.subr.bf16.mxu1 %v601_v35 }
  0xf9   :  { %v588_v45 = vpack.c.bf16 %v346_v43, %v345_v44 }
  0xfb   :  { %589 = vmatpush3.bf16.msra.mxu1 %v588_v45 }
  0xfe   :  { %564 = vmatmul.mubr.f32.vlgmr.msra.gmra.mrb[0].mxu1 %v347_v46 }
 0x1d1   :  { %v420_v50 = vpop.f32.mrb[0].mxu1 }
 0x1d2   :  { %v421_v51 = vadd.f32 %v420_v50, %v352_v49  ;;  %v565_v52 = vpop.f32.mrb[1].mxu1 }
 0x1d4   :  { %v427_v53 = vsel %vm426_vm3, %v421_v51, -inf }
 0x1d5   :  { %v428_v54 = vrot.slane %v427_v53, 4 }
 0x1d7   :  { %v429_v55 = vmax.f32 %v427_v53, %v428_v54 }
 0x1d9   :  { %v430_v56 = vrot.slane %v429_v55, 2 }
 0x1db   :  { %v431_v35 = vmax.f32 %v429_v55, %v430_v56 }
 0x1dd   :  { %v432_v57 = vrot.slane %v431_v35, 1 }
 0x1df   :  { %v433_v58 = vmax.f32 %v431_v35, %v432_v57 }
 0x1e1   :  { %v434_v59 = vsub.f32 %v427_v53, %v433_v58 }
 0x1e3   :  { %v435_v60 = vmul.f32 1.442695, %v434_v59 }
 0x1e5   :  { %596 = vpow2.f32 %v435_v60 }
 0x1ef   :  { %v597_v61 = vpop.eup %596 }
 0x1f0   :  { %v437_v62 = vrot.slane %v597_v61, 4 }
 0x1f2   :  { %v438_v63 = vadd.f32 %v597_v61, %v437_v62 }
 0x1f4   :  { %v439_v0 = vrot.slane %v438_v63, 2 }
 0x1f6   :  { %v440_v1 = vadd.f32 %v439_v0, %v438_v63 }
 0x1f8   :  { %v441_v2 = vrot.slane %v440_v1, 1 }
 0x1fa   :  { %v442_v3 = vadd.f32 %v441_v2, %v440_v1 }
 0x1fc   :  { %598 = vrcp.f32 %v442_v3 }
 0x206   :  { %v599_v4 = vpop.eup %598 }
 0x207   :  { %v444_v5 = vmul.f32 %v599_v4, %v442_v3 }
 0x209   :  { %v445_v6 = vsub.f32 2.0, %v444_v5 }
 0x20b   :  { %v446_v7 = vmul.f32 %v599_v4, %v445_v6 }
 0x20d   :  { %v447_v8 = vmul.f32 %v597_v61, %v446_v7 }
 0x20f   :  { %v448_v9 = vsel %vm426_vm3, %v447_v8, %v421_v51 }
 0x210   :  { %449 = vst [vmem:[%s773_s5] sm:$0xff] %v448_v9 }

</bundles_post_ra>
